<compile_context>
chip_gen: v7x
topology: tpu7x:2x2x1
jax: 0.10.0
libtpu: 0.0.40
codegen_flags: <defaults>
</compile_context>

<pallas_src>
import functools
import math

import jax
import jax.numpy as jnp
from jax.experimental import pallas as pl
from jax.experimental.pallas import tpu as pltpu


# ----------------------------------------------------------------------------
# Kernels (activation mode + bounds are compile-time constants)
# ----------------------------------------------------------------------------
def _bounded_relu_kernel(x_ref, o_ref, *, lo_eff, hi):
    # clamp(relu(x), lo, hi) == clip(x, max(lo, 0), hi): one VPU clip.
    o_ref[...] = jnp.clip(x_ref[...], lo_eff, hi).astype(o_ref.dtype)


def _smooth_clamp_kernel(x_ref, o_ref, *, center, scale):
    # Keep the tanh path in f32 so the EUP handles it uniformly on v5e/v6e/v7x.
    x = x_ref[...].astype(jnp.float32)
    y = center + scale * jnp.tanh((x - center) / scale)
    o_ref[...] = y.astype(o_ref.dtype)


def _relu_kernel(x_ref, o_ref):
    o_ref[...] = jnp.maximum(x_ref[...], 0.0).astype(o_ref.dtype)


def _energy_preserving_kernel(x_ref, o_ref):
    # L2 norm over the last (feature) axis, fully resident per block.
    x = x_ref[...].astype(jnp.float32)
    norm = jnp.sqrt(jnp.sum(x * x, axis=-1, keepdims=True))
    # relu(norm) == norm (an L2 norm is >= 0), so out = x * norm / (norm + eps).
    scale = norm / (norm + 1e-8)          # exact reciprocal on EUP, bit-faithful
    o_ref[...] = (x * scale).astype(o_ref.dtype)


# ----------------------------------------------------------------------------
# Tiling helpers
# ----------------------------------------------------------------------------
def _sublane_multiple(dtype):
    # f32 -> 8, bf16/f16 -> 16, int8/fp8 -> 32 (packed-sublane granularity).
    return max(8, 32 // jnp.dtype(dtype).itemsize)


def _row_tile(rows, cols, dtype):
    sub = _sublane_multiple(dtype)
    if rows <= sub:
        return rows                               # full row extent: always legal
    # ~6 MiB per buffer (counted in f32-equivalent bytes to cover in-kernel
    # upcasts); 2x(in+out) double-buffered tiles stay << vmem_limit below.
    bytes_per_elem = max(4, jnp.dtype(dtype).itemsize)
    budget_bytes = 6 * 1024 * 1024
    cap = (budget_bytes // max(cols * bytes_per_elem, 1)) // sub * sub
    cap = max(sub, cap)
    # Aim for >= 4 grid steps so v7x's two TensorCores both get row tiles.
    target = pl.cdiv(rows, 4)
    target = max(sub, pl.cdiv(target, sub) * sub)
    tr = min(cap, target)
    rows_up = pl.cdiv(rows, sub) * sub
    return max(sub, min(tr, rows_up))


def _elementwise_slab(shape):
    """Pick a lane-dense 2-D view for pure elementwise modes (no padding)."""
    total = int(math.prod(shape)) if len(shape) else 1
    feat = int(shape[-1]) if len(shape) else 1
    if feat >= 128 and feat % 128 == 0:
        return total // feat, feat                # already lane-dense, free collapse
    if total % 128 == 0:
        c = 128
        while c * 2 <= 1024 and total % (c * 2) == 0:
            c *= 2                                # widest 128-multiple divisor <= 1024
        return total // c, c
    # Tiny / awkward totals: keep the original feature axis (single full block).
    return total // max(feat, 1), feat


# ----------------------------------------------------------------------------
# Wrapper
# ----------------------------------------------------------------------------
def physics_informed_activation(x, activation_type="bounded_relu",
                                bounds=(-1.0, 1.0)):
    """Functional equivalent of PhysicsInformedActivation(activation_type, bounds)(x)."""
    lo, hi = float(bounds[0]), float(bounds[1])
    orig_shape = x.shape

    if activation_type == "energy_preserving":
        kernel = _energy_preserving_kernel
        feat = int(orig_shape[-1])
        rows = int(math.prod(orig_shape[:-1])) if len(orig_shape) > 1 else 1
        cols = feat                               # keep row reduction in-block
    else:
        if activation_type == "bounded_relu":
            kernel = functools.partial(_bounded_relu_kernel,
                                       lo_eff=max(lo, 0.0), hi=hi)
        elif activation_type == "smooth_clamp":
            center = (hi + lo) / 2.0
            scale = (hi - lo) / 2.0
            kernel = functools.partial(_smooth_clamp_kernel,
                                       center=center, scale=scale)
        else:
            kernel = _relu_kernel                 # module falls back to nn.ReLU()
        rows, cols = _elementwise_slab(orig_shape)

    x2 = x.reshape(rows, cols)
    tr = _row_tile(rows, cols, x.dtype)

    out = pl.pallas_call(
        kernel,
        grid=(pl.cdiv(rows, tr),),                # ragged last block: masked, no pad
        in_specs=[pl.BlockSpec((tr, cols), lambda i: (i, 0))],
        out_specs=pl.BlockSpec((tr, cols), lambda i: (i, 0)),
        out_shape=jax.ShapeDtypeStruct((rows, cols), x.dtype),
        compiler_params=pltpu.CompilerParams(
            dimension_semantics=("parallel",),    # row axis shards across TCs (v7x)
            vmem_limit_bytes=40 * 1024 * 1024,    # keep double buffering on v5e,
        ),                                        # still < 64 MiB physical on v7x
    )(x2)

    return out.reshape(orig_shape)


# ----------------------------------------------------------------------------
# Demo / self-check
# ----------------------------------------------------------------------------
if __name__ == "__main__":
    key = jax.random.PRNGKey(0)
    k1, k2 = jax.random.split(key)
    # Lane-dense shape (batch=2, seq=8, hidden=256) and a ragged, non-128
    # hidden shape (3, 7, 96) to exercise the masked final tile path.
    x = 2.0 * jax.random.normal(k1, (2, 8, 256), jnp.float32)
    xr = 2.0 * jax.random.normal(k2, (3, 7, 96), jnp.float32)

    # --- run kernels ---
    y_br = jax.block_until_ready(
        physics_informed_activation(x, "bounded_relu", bounds=(-1.0, 1.0)))
    y_br2 = jax.block_until_ready(
        physics_informed_activation(x, "bounded_relu", bounds=(0.0, 0.5)))
    y_sc = jax.block_until_ready(
        physics_informed_activation(x, "smooth_clamp", bounds=(-2.0, 3.0)))
    y_ep = jax.block_until_ready(
        physics_informed_activation(x, "energy_preserving"))
    y_rl = jax.block_until_ready(
        physics_informed_activation(x, "plain"))
    yr_br = jax.block_until_ready(
        physics_informed_activation(xr, "bounded_relu", bounds=(-1.0, 1.0)))
    yr_ep = jax.block_until_ready(
        physics_informed_activation(xr, "energy_preserving"))

    # --- references (plain jnp) ---
    ref_br = jnp.clip(jnp.maximum(x, 0.0), -1.0, 1.0)
    ref_br2 = jnp.clip(jnp.maximum(x, 0.0), 0.0, 0.5)
    c, s = (3.0 + -2.0) / 2.0, (3.0 - -2.0) / 2.0
    ref_sc = c + s * jnp.tanh((x - c) / s)
    norm = jnp.linalg.norm(x, axis=-1, keepdims=True)
    ref_ep = (x / (norm + 1e-8)) * jnp.maximum(norm, 0.0)
    ref_rl = jnp.maximum(x, 0.0)
    refr_br = jnp.clip(jnp.maximum(xr, 0.0), -1.0, 1.0)
    normr = jnp.linalg.norm(xr, axis=-1, keepdims=True)
    refr_ep = (xr / (normr + 1e-8)) * jnp.maximum(normr, 0.0)

    assert y_br.shape == x.shape
    assert jnp.allclose(y_br, ref_br, atol=1e-5, rtol=1e-5)
    assert jnp.allclose(y_br2, ref_br2, atol=1e-5, rtol=1e-5)
    assert jnp.allclose(y_sc, ref_sc, atol=1e-5, rtol=1e-5)
    assert jnp.allclose(y_ep, ref_ep, atol=1e-5, rtol=1e-5)
    assert jnp.allclose(y_rl, ref_rl, atol=1e-5, rtol=1e-5)
    assert yr_br.shape == xr.shape
    assert jnp.allclose(yr_br, refr_br, atol=1e-5, rtol=1e-5)
    assert jnp.allclose(yr_ep, refr_ep, atol=1e-5, rtol=1e-5)

    print("KERNEL_OK")
</pallas_src>

<mosaic_0001>
module attributes {stable_mosaic.version = 11 : i64} {
  func.func @_bounded_relu_kernel(%arg0: i32, %arg1: memref<8x256xf32, #tpu.memory_space<vmem>>, %arg2: memref<8x256xf32, #tpu.memory_space<vmem>>) attributes {dimension_semantics = [#tpu.dimension_semantics<parallel>], iteration_bounds = array<i64: 2>, scalar_prefetch = 0 : i64, scratch_operands = 0 : i64, tpu.core_type = #tpu.core_type<tc>, window_params = [{transform_indices = @transform_0, window_bounds = array<i64: 8, 256>}, {transform_indices = @transform_1, window_bounds = array<i64: 8, 256>}]} {
    %c0 = arith.constant 0 : index
    %c0_0 = arith.constant 0 : index
    %0 = vector.load %arg1[%c0, %c0_0] : memref<8x256xf32, #tpu.memory_space<vmem>>, vector<8x256xf32>
    %cst = arith.constant 0.000000e+00 : f32
    %cst_1 = arith.constant 1.000000e+00 : f32
    %1 = vector.broadcast %cst : f32 to vector<8x256xf32>
    %2 = arith.maximumf %1, %0 : vector<8x256xf32>
    %3 = vector.broadcast %cst_1 : f32 to vector<8x256xf32>
    %4 = arith.minimumf %3, %2 : vector<8x256xf32>
    %c0_2 = arith.constant 0 : index
    %c0_3 = arith.constant 0 : index
    %5 = vector.load %arg2[%c0_2, %c0_3] : memref<8x256xf32, #tpu.memory_space<vmem>>, vector<8x256xf32>
    tpu.vector_store %arg2[%c0_2, %c0_3], %4 {strides = array<i32>} : memref<8x256xf32, #tpu.memory_space<vmem>>, vector<8x256xf32>,
    return
  }
  func.func @transform_0(%arg0: i32) -> (i32, i32) {
    %c0_i32 = arith.constant 0 : i32
    %c0_i32_0 = arith.constant 0 : i32
    return %arg0, %c0_i32 : i32, i32
  }
  func.func @transform_1(%arg0: i32) -> (i32, i32) {
    %c0_i32 = arith.constant 0 : i32
    %c0_i32_0 = arith.constant 0 : i32
    return %arg0, %c0_i32 : i32, i32
  }
}

</mosaic_0001>

<bundles_post_ra>
// kernel: tpu_custom_call.1
= control target key start
LH: loop header
LB: loop body
LE: loop exit
PB: predicated region body
PF: predicated region fallthrough
CT: control target
= control target key end

     0   :  { %6 = vsyncpa [#allocation3], 0  ;;  %s559_s0 = inlined_call_operand.hbm [shape: f32[16,256], index: 0, kind: input, shape index: {}]   ;;  %s560_s1 = inlined_call_operand.hbm [shape: f32[16,256], index: 1, kind: output, shape index: {}]  }
   0x1   :  { %8 = vsyncpa [#allocation3 + $0x1], 0 }
   0x2   :  { %9 = vsyncpa [#allocation4], 0 }
   0x3   :  { %11 = vsyncpa [#allocation4 + $0x1], 0  ;;  %s398_s6 = smov 0   ;;  %s400_s7 = smov 0  }
   0x4   :  { %s402_s8 = smov 0   ;;  %s404_s9 = smov 0  }
   0x5 LB: > { %s419_s10 = sadd.s32 4294967295, %s384_s9   ;;  %s226_s11 = sadd.s32 4294967294, %s384_s9   ;;  %s384_s9 = sphi %s404_s9, %s575_s9   ;;  %s380_s8 = sphi %s402_s8, %s574_s8   ;;  %s376_s7 = sphi %s400_s7, %s573_s7   ;;  %s372_s6 = sphi %s398_s6, %s572_s6  }
   0x6   : > { %s423_s12 = sadd.s32 1, %s384_s9   ;;  %s24_s13 = sadd.s32 1, %s380_s8 }
   0x7   : > { %s21_s14 = ssub.s32 %s384_s9, %s423_s12  ;;  %p31_p0 = scmp.ne.s32.totalorder %s380_s8, %s376_s7 }
   0x8   : > { %p22_p1 = scmp.eq.s32.totalorder %s21_s14, 0  ;;  %p32_p2 = scmp.eq.s32.totalorder %s384_s9, 0 }
   0x9   : > { %p37_p3 = scmp.ne.s32.totalorder %s376_s7, %s372_s6  ;;  %p38_p4 = scmp.eq.s32.totalorder %s419_s10, 0 }
   0xa   : > { %s435_s15 = scalar_select %p22_p1, %s380_s8, %s24_s13  }
   0xb   : > { %p437_p5 = por %p32_p2, %p31_p0  ;;  %p441_p6 = por %p38_p4, %p37_p3 }
   0xc   : > { %p61_p7 = scmp.eq.s32.totalorder %s419_s10, 1  ;;  %p67_p8 = scmp.eq.s32.totalorder %s226_s11, 1 }
   0xd   : > { %p254_p10 = scmp.lt.s32.totalorder %s384_s9, 2  ;;  %s87_s20 = sand.u32 1, %s380_s8  }
   0xe   : > { %p448_p11 = por %p61_p7, %p31_p0  ;;  %p452_p12 = por %p67_p8, %p37_p3 }
   0xf   : > { %s240_s21 = sshll.u32 %s384_s9, 8  ;;  %s229_s22 = sshll.u32 %s87_s20, 4 }
  0x10   : > { %s564_s18 = scalar_select %p448_p11, 1, 0 }
  0x11   : > { %s565_s19 = scalar_select %p452_p12, 1, 0 }
  0x12   : > { %s461_s25 = scalar_lea.hbm %s559_s0, %s240_s21  ;;  %s91_s26 = scalar_lea.vmem [#allocation2], %s229_s22 }
  0x13   : > { %s99_s27 = sshll.u32 %s91_s26, 4  ;;  %p465_p13 = pnand %p254_p10, %p437_p5  ;;  %s469_s27 = int_to_ptr.vmem [resolvable:$true] %s99_s27 }
  0x14   : > { %s88_s29 = scalar_lea.sflag [#allocation3], %s87_s20  ;;  %s288_s30 = scalar_lea.hbm %s461_s25, 256 }
  0x15   : > { %p289_p2 = scmp.ne.s32.totalorder %s461_s25, %s288_s30  ;;  %p290_p3 = pneg %p465_p13 }
  0x16   : > { %s293_s4 = scalar_lea.hbm %s559_s0, 512  ;;  %p294_p5 = scmp.lt.u32.totalorder %s461_s25, %s559_s0 }
  0x17   : > { %p291_p4 = pnand %p290_p3, %p289_p2  ;;  %p295_p8 = scmp.lt.u32.totalorder %s293_s4, %s288_s30 }
  0x18   : > { %p297_p9 = scmp.lt.u32.totalorder %s288_s30, %s461_s25 }
  0x19   : > { %p292_p7 = pneg %p291_p4  ;;  %p296_p10 = por %p295_p8, %p294_p5 }
  0x1b   : > { %p298_p0 = por %p297_p9, %p296_p10 }
  0x1d   : > { %p299_p1 = pnand %p298_p0, %p292_p7 }
  0x1f   : > { %302 = shalt.err (!%p299_p1)
}
  0x20   : > { %s303_s13 = scalar_lea.vmem %s469_s27, 256  ;;  %s386_s14 = smov [#allocation2]  }
  0x21   : > { %p304_p2 = scmp.ne.s32.totalorder %s469_s27, %s303_s13  ;;  %s308_s16 = sshll.u32 %s386_s14, 4  ;;  %s309_s16 = int_to_ptr.vmem [resolvable:$false] %s308_s16 }
  0x22   : > { %s310_s20 = scalar_lea.vmem %s309_s16, 512  ;;  %p311_p11 = scmp.lt.s32.totalorder %s469_s27, %s309_s16 }
  0x23   : > { %p306_p4 = pnand %p304_p2, %p290_p3  ;;  %p312_p5 = scmp.lt.s32.totalorder %s310_s20, %s303_s13 }
  0x25   : > { %p307_p12 = pneg %p306_p4  ;;  %p313_p8 = por %p312_p5, %p311_p11 }
  0x27   : > { %p314_p9 = pnand %p313_p8, %p307_p12 }
  0x29   : > { %317 = shalt.err (!%p314_p9)
}
  0x2a   : > { %249 = dma.hbm_to_vmem [thread:$0]  (!%p465_p13), %s461_s25, 256, %s469_s27, %s88_s29  }
  0x2b   : > { %p567_p0 = scmp.lt.s32.totalorder %s384_s9, 3  ;;  %p568_p1 = scmp.ge.s32.totalorder %s384_s9, 1 }
  0x2d   : > { %p105_p3 = pnand %p568_p1, %p567_p0 }
  0x2e   : > { %s503_s21 = sand.u32 (!%p105_p3), 1, %s376_s7  }
  0x2f   : > { %108 = sbr.rel (%p105_p3) target bundleno = 81 (0x51), region = 24  ;;  %s233_s22 = sshll.u32 (!%p105_p3), %s503_s21, 4 }
  0x30   : > { %s111_s23 = scalar_lea.sflag (!%p105_p3), [#allocation3], %s503_s21  ;;  %s114_s24 = scalar_lea.vmem (!%p105_p3), [#allocation2], %s233_s22 }
  0x36   : > { %363 = dma.done.wait (%p441_p6), %s111_s23, 256  }
  0x37   : > { %365 = vsyncadd (%p441_p6), %s111_s23, 4294967040  ;;  %v133_v0 = vld [vmem:[%s114_s24] sm:$0xff]  ;;  %s132_s25 = scalar_lea.vmem [#allocation5], %s233_s22  ;;  %v134_v1 = vld [vmem:[%s114_s24 + $0x8] sm:$0xff]  ;;  %s241_s27 = sshll.u32 %s419_s10, 8 }
  0x38   : > { %s156_s26 = sshll.u32 %s132_s25, 4  ;;  %v135_v2 = vmax.f32 %v133_v0, 0.0  ;;  %v136_v3 = vmax.f32 %v134_v1, 0.0  ;;  %s517_s29 = scalar_lea.hbm %s560_s1, %s241_s27  ;;  %s512_s26 = int_to_ptr.vmem [resolvable:$true] %s156_s26 }
  0x39   : > { %s142_s30 = scalar_lea.sflag [#allocation4], %s503_s21  ;;  %s318_s2 = scalar_lea.vmem %s512_s26, 256 }
  0x3a   : > { %v137_v4 = vmin.f32 %v135_v2, 1.0  ;;  %v138_v5 = vmin.f32 %v136_v3, 1.0  ;;  %p319_p6 = scmp.ne.s32.totalorder %s512_s26, %s318_s2  ;;  %p569_p11 = scmp.ne.s32.totalorder %s564_s18, 0 }
  0x3b   : > { %s387_s10 = smov [#allocation5]  }
  0x3c   : > { %139 = vst [vmem:[%s132_s25] sm:$0xff] %v137_v4  ;;  %140 = vst [vmem:[%s132_s25 + $0x8] sm:$0xff] %v138_v5  ;;  %p320_p12 = pnand %p319_p6, %p569_p11  ;;  %s322_s3 = sshll.u32 %s387_s10, 4  ;;  %s323_s3 = int_to_ptr.vmem [resolvable:$false] %s322_s3 }
  0x3d   : > { %s324_s4 = scalar_lea.vmem %s323_s3, 512  ;;  %p325_p7 = scmp.lt.s32.totalorder %s512_s26, %s323_s3 }
  0x3e   : > { %p321_p13 = pneg %p320_p12  ;;  %p326_p10 = scmp.lt.s32.totalorder %s324_s4, %s318_s2 }
  0x40   : > { %p327_p2 = por %p326_p10, %p325_p7 }
  0x42   : > { %p328_p4 = pnand %p327_p2, %p321_p13 }
  0x44   : > { %331 = shalt.err (!%p328_p4)
}
  0x45   : > { %s332_s5 = scalar_lea.hbm %s517_s29, 256  ;;  %s336_s14 = scalar_lea.hbm %s560_s1, 512 }
  0x46   : > { %p333_p5 = scmp.ne.s32.totalorder %s517_s29, %s332_s5  ;;  %p337_p0 = scmp.lt.u32.totalorder %s517_s29, %s560_s1 }
  0x47   : > { %p338_p1 = scmp.lt.u32.totalorder %s336_s14, %s332_s5  ;;  %p340_p6 = scmp.lt.u32.totalorder %s332_s5, %s517_s29 }
  0x48   : > { %p334_p8 = pnand %p333_p5, %p569_p11 }
  0x49   : > { %p339_p3 = por %p338_p1, %p337_p0 }
  0x4a   : > { %p335_p9 = pneg %p334_p8 }
  0x4b   : > { %p341_p12 = por %p340_p6, %p339_p3 }
  0x4d   : > { %p342_p13 = pnand %p341_p12, %p335_p9 }
  0x4f   : > { %345 = shalt.err (!%p342_p13)
}
  0x50   : > { %244 = dma.vmem_to_hbm [thread:$0]  (%p569_p11), %s512_s26, 256, %s517_s29, %s142_s30  }
  0x51 PF: > { %s168_s21 = sand.u32 1, %s372_s6   ;;  %p570_p7 = scmp.ne.s32.totalorder %s565_s19, 0 }
  0x52   : > { %p571_p10 = scmp.ge.s32.totalorder %s384_s9, 2  ;;  %s169_s22 = scalar_lea.sflag [#allocation4], %s168_s21 }
  0x54   : > { %p251_p2 = pnand %p571_p10, %p570_p7 }
  0x56   : > { %367 = dma.done.wait (!%p251_p2), %s169_s22, 256  }
  0x57   : > { %369 = vsyncadd (!%p251_p2), %s169_s22, 4294967040  ;;  %p14_p4 = scmp.ge.s32.totalorder %s423_s12, 4   ;;  %s572_s6 = smov %s376_s7 }
  0x58   : > { %s573_s7 = smov %s380_s8  ;;  %s574_s8 = smov %s435_s15 }
  0x59   : > { %s575_s9 = smov %s423_s12  ;;  %16 = sbr.rel (!%p14_p4) target bundleno = 5 (0x5), region = 69 }
  0x60   :  { %174 = vsyncpa [#allocation3], 1 }
  0x61   :  { %176 = vsyncpa [#allocation3 + $0x1], 1 }
  0x62   :  { %177 = vsyncpa [#allocation4], 1 }
  0x63   :  { %179 = vsyncpa [#allocation4 + $0x1], 1 }

</bundles_post_ra>
